<compile_context>
chip_gen: v5e
topology: v5e:2x2
jax: 0.10.0
libtpu: 0.0.40
codegen_flags: <defaults>
</compile_context>

<pallas_src>
import jax
import jax.numpy as jnp
import numpy as np
from jax.experimental import pallas as pl
from jax.experimental.pallas import tpu as pltpu


# ----------------------------------------------------------------------------
# Kernel bodies
# ----------------------------------------------------------------------------
def _lstm_fc_core(x_ref, w_ih_ref, w_hh_ref, b_ref, w_fc_ref, b_fc_ref,
                  q_ref, h_out_ref, c_out_ref, h, c):
    """Shared LSTM recurrence + final-step fc.  Gate order is [i, f, o, g]."""
    T, Bt, D = x_ref.shape
    H = h_out_ref.shape[-1]

    # ---- Phase 1 (non-recurrent, hoisted): projection for ALL timesteps ----
    # One tall (T*Bt, D) @ (D, 4H) MXU matmul.  The leading-axis collapse
    # (T, Bt, D) -> (T*Bt, D) is free when Bt % 8 == 0 (production batch
    # tiles); at the tiny test tile it is a single one-time relayout, off the
    # serial critical path.
    x2d = x_ref[...].reshape(T * Bt, D)
    xw = jnp.dot(x2d, w_ih_ref[...],
                 preferred_element_type=jnp.float32) + b_ref[...]
    # Time-major slab: xw[t] below is a free leading-axis slab read.
    xw = xw.reshape(T, Bt, 4 * H)

    w_hh = w_hh_ref[...]                       # resident (H, 4H)
    op_dtype = w_hh.dtype                      # f32 (parity) or bf16 (prod)

    # ---- Phase 2: serial recurrence (T static & small -> full unroll) ------
    for t in range(T):
        gates = xw[t] + jnp.dot(h.astype(op_dtype), w_hh,
                                preferred_element_type=jnp.float32)
        # Permuted gate layout [i, f, o, g]: one sigmoid on a contiguous 3H
        # slab, one tanh on the trailing H slab.  Gate math stays f32 (VPU/EUP).
        sig = jax.nn.sigmoid(gates[:, 0:3 * H])
        i_g = sig[:, 0 * H:1 * H]
        f_g = sig[:, 1 * H:2 * H]
        o_g = sig[:, 2 * H:3 * H]
        g_g = jnp.tanh(gates[:, 3 * H:4 * H])
        c = f_g * c + i_g * g_g
        h = o_g * jnp.tanh(c)

    # ---- fc on the last timestep's hidden state -----------------------------
    q_ref[...] = (jnp.dot(h, w_fc_ref[...],
                          preferred_element_type=jnp.float32) + b_fc_ref[...])
    h_out_ref[...] = h
    c_out_ref[...] = c


def _drqn_kernel_zero_state(x_ref, w_ih_ref, w_hh_ref, b_ref, w_fc_ref,
                            b_fc_ref, q_ref, h_out_ref, c_out_ref):
    """hidden_state=None path: (h0, c0) never touch HBM, init in VMEM."""
    Bt = x_ref.shape[1]
    H = h_out_ref.shape[-1]
    h = jnp.zeros((Bt, H), jnp.float32)
    c = jnp.zeros((Bt, H), jnp.float32)
    _lstm_fc_core(x_ref, w_ih_ref, w_hh_ref, b_ref, w_fc_ref, b_fc_ref,
                  q_ref, h_out_ref, c_out_ref, h, c)


def _drqn_kernel_with_state(x_ref, h0_ref, c0_ref, w_ih_ref, w_hh_ref, b_ref,
                            w_fc_ref, b_fc_ref, q_ref, h_out_ref, c_out_ref):
    h = h0_ref[...]
    c = c0_ref[...]
    _lstm_fc_core(x_ref, w_ih_ref, w_hh_ref, b_ref, w_fc_ref, b_fc_ref,
                  q_ref, h_out_ref, c_out_ref, h, c)


# ----------------------------------------------------------------------------
# Wrapper
# ----------------------------------------------------------------------------
def _vmem_tile_estimate_bytes(T, tb, D, H, O):
    """Rough per-batch-tile VMEM footprint (f32), incl. double-buffering."""
    f32 = 4
    x_tile = 2 * T * tb * D * f32                      # double-buffered input
    weights = ((D + H) * 4 * H + 4 * H + H * O + O) * f32
    xw_slab = T * tb * 4 * H * f32
    outs = 2 * (tb * O + 2 * tb * H) * f32             # double-buffered outputs
    working = 6 * tb * H * f32                         # h, c, gates, temporaries
    return x_tile + weights + xw_slab + outs + working


def drqn_forward(x, params, hidden_state=None, *, batch_tile=None,
                 matmul_dtype=jnp.float32):
    """DRQN forward: x (B, T, input_dim) batch_first, like the PyTorch module.

    params = (w_ih (D,4H), w_hh (H,4H), b (1,4H), w_fc (H,O), b_fc (1,O)),
    gate order [i, f, g, o] (PyTorch).  Returns (q_values, (h_n, c_n)) with
    h_n/c_n shaped (1, B, H).
    """
    B, T, D = x.shape
    w_ih, w_hh, b, w_fc, b_fc = params
    H = w_hh.shape[0]
    O = w_fc.shape[1]

    # Batch tile (grid over batch; recurrence is independent per row).
    tb = B if batch_tile is None else batch_tile
    assert B % tb == 0, "batch must be divisible by batch_tile"
    assert tb == B or tb % 8 == 0, "batch_tile should be a multiple of 8"
    grid = (B // tb,)

    # Permute gate columns to [i, f, o, g] (do once at init time in prod).
    def _perm_gates(w):
        return jnp.concatenate(
            [w[..., 0:2 * H], w[..., 3 * H:4 * H], w[..., 2 * H:3 * H]],
            axis=-1)

    w_ih_k = _perm_gates(w_ih).astype(matmul_dtype)
    w_hh_k = _perm_gates(w_hh).astype(matmul_dtype)
    b_k = _perm_gates(b).astype(jnp.float32)           # bias added post-MXU in f32

    # Layout plumbing in the wrapper: time-major x, one cheap HBM pass.
    x_tm = jnp.transpose(x, (1, 0, 2)).astype(matmul_dtype)   # (T, B, D)

    x_spec = pl.BlockSpec((T, tb, D), lambda bi: (0, bi, 0))
    full = lambda shape: pl.BlockSpec(shape, lambda bi: tuple(0 for _ in shape))
    weight_specs = [full((D, 4 * H)), full((H, 4 * H)), full((1, 4 * H)),
                    full((H, O)), full((1, O))]
    out_specs = (pl.BlockSpec((tb, O), lambda bi: (bi, 0)),
                 pl.BlockSpec((tb, H), lambda bi: (bi, 0)),
                 pl.BlockSpec((tb, H), lambda bi: (bi, 0)))
    out_shape = (jax.ShapeDtypeStruct((B, O), jnp.float32),
                 jax.ShapeDtypeStruct((B, H), jnp.float32),
                 jax.ShapeDtypeStruct((B, H), jnp.float32))

    # Compiler params: parallel batch axis; only raise vmem_limit_bytes when
    # the per-tile footprint exceeds the tightest default scoped limit (32 MiB
    # on v6e/v7x).  On v7x (64 MiB physical) pick batch_tile so the estimate
    # stays <= ~24 MiB.
    est = _vmem_tile_estimate_bytes(T, tb, D, H, O)
    cp_kwargs = dict(dimension_semantics=("parallel",))
    if est > 30 * 1024 * 1024:
        cp_kwargs["vmem_limit_bytes"] = min(int(est * 1.5), 64 * 1024 * 1024)
    compiler_params = pltpu.CompilerParams(**cp_kwargs)

    cost = pl.CostEstimate(
        flops=2 * B * T * D * 4 * H + 2 * T * B * H * 4 * H + 2 * B * H * O,
        transcendentals=B * T * 5 * H,
        bytes_accessed=4 * (B * T * D + (D + H) * 4 * H + 4 * H + H * O + O
                            + B * O + 2 * B * H))

    if hidden_state is None:
        q, h_n, c_n = pl.pallas_call(
            _drqn_kernel_zero_state,
            out_shape=out_shape,
            grid=grid,
            in_specs=[x_spec] + weight_specs,
            out_specs=out_specs,
            compiler_params=compiler_params,
            cost_estimate=cost,
        )(x_tm, w_ih_k, w_hh_k, b_k, w_fc, b_fc)
    else:
        h0, c0 = hidden_state
        h0 = jnp.asarray(h0, jnp.float32).reshape(B, H)
        c0 = jnp.asarray(c0, jnp.float32).reshape(B, H)
        state_spec = pl.BlockSpec((tb, H), lambda bi: (bi, 0))
        # TODO(synk): in production, add input_output_aliases={1: 1, 2: 2} to
        # reuse the h0/c0 buffers for h_n/c_n (requires donating the inputs).
        q, h_n, c_n = pl.pallas_call(
            _drqn_kernel_with_state,
            out_shape=out_shape,
            grid=grid,
            in_specs=[x_spec, state_spec, state_spec] + weight_specs,
            out_specs=out_specs,
            compiler_params=compiler_params,
            cost_estimate=cost,
        )(x_tm, h0, c0, w_ih_k, w_hh_k, b_k, w_fc, b_fc)

    # Match PyTorch hidden_state shape (num_layers=1, B, H).
    return q, (h_n[None, :, :], c_n[None, :, :])


# ----------------------------------------------------------------------------
# Init + pure-JAX reference (PyTorch gate order, f32)
# ----------------------------------------------------------------------------
def init_params(key, input_dim, hidden_dim, output_dim):
    """Deterministic init mimicking PyTorch's uniform(-1/sqrt(H), 1/sqrt(H))."""
    k = 1.0 / np.sqrt(hidden_dim)
    keys = jax.random.split(key, 6)
    # PyTorch stores weight_ih_l0 as (4H, D); pre-transposed to x @ W form.
    w_ih = jax.random.uniform(keys[0], (input_dim, 4 * hidden_dim),
                              jnp.float32, -k, k)
    w_hh = jax.random.uniform(keys[1], (hidden_dim, 4 * hidden_dim),
                              jnp.float32, -k, k)
    b_ih = jax.random.uniform(keys[2], (1, 4 * hidden_dim), jnp.float32, -k, k)
    b_hh = jax.random.uniform(keys[3], (1, 4 * hidden_dim), jnp.float32, -k, k)
    b = b_ih + b_hh
    w_fc = jax.random.uniform(keys[4], (hidden_dim, output_dim),
                              jnp.float32, -k, k)
    b_fc = jax.random.uniform(keys[5], (1, output_dim), jnp.float32, -k, k)
    return (w_ih, w_hh, b, w_fc, b_fc)


def drqn_reference(x, params, hidden_state=None):
    """Pure-JAX reference (lax.scan LSTM) for correctness checking."""
    w_ih, w_hh, b, w_fc, b_fc = params
    B = x.shape[0]
    H = w_hh.shape[0]

    if hidden_state is None:
        h = jnp.zeros((B, H), jnp.float32)
        c = jnp.zeros((B, H), jnp.float32)
    else:
        h, c = hidden_state
        h = jnp.asarray(h, jnp.float32).reshape(B, H)
        c = jnp.asarray(c, jnp.float32).reshape(B, H)

    def step(carry, x_t):
        h, c = carry
        gates = x_t @ w_ih + h @ w_hh + b
        i = jax.nn.sigmoid(gates[:, 0 * H:1 * H])
        f = jax.nn.sigmoid(gates[:, 1 * H:2 * H])
        g = jnp.tanh(gates[:, 2 * H:3 * H])
        o = jax.nn.sigmoid(gates[:, 3 * H:4 * H])
        c = f * c + i * g
        h = o * jnp.tanh(c)
        return (h, c), h

    (h_n, c_n), _ = jax.lax.scan(step, (h, c), jnp.transpose(x, (1, 0, 2)))
    q = h_n @ w_fc + b_fc
    return q, (h_n[None], c_n[None])


if __name__ == "__main__":
    B, T, input_dim, hidden_dim, output_dim = 2, 8, 16, 32, 4

    key = jax.random.PRNGKey(0)
    k_x, k_p = jax.random.split(key)
    x = jax.random.normal(k_x, (B, T, input_dim), jnp.float32)
    params = init_params(k_p, input_dim, hidden_dim, output_dim)

    # Path 1: hidden_state=None (zero state initialized inside the kernel).
    q, (h_n, c_n) = drqn_forward(x, params)
    jax.block_until_ready((q, h_n, c_n))

    q_ref, (h_ref, c_ref) = drqn_reference(x, params)
    assert q.shape == (B, output_dim)
    assert h_n.shape == (1, B, hidden_dim) and c_n.shape == (1, B, hidden_dim)
    np.testing.assert_allclose(np.asarray(q), np.asarray(q_ref),
                               atol=1e-5, rtol=1e-5)
    np.testing.assert_allclose(np.asarray(h_n), np.asarray(h_ref),
                               atol=1e-5, rtol=1e-5)
    np.testing.assert_allclose(np.asarray(c_n), np.asarray(c_ref),
                               atol=1e-5, rtol=1e-5)

    # Path 2: explicit hidden_state (second branch of the PyTorch forward).
    q2, (h2, c2) = drqn_forward(x, params, hidden_state=(h_n, c_n))
    jax.block_until_ready((q2, h2, c2))
    q2_ref, (h2_ref, c2_ref) = drqn_reference(x, params,
                                              hidden_state=(h_ref, c_ref))
    np.testing.assert_allclose(np.asarray(q2), np.asarray(q2_ref),
                               atol=1e-5, rtol=1e-5)
    np.testing.assert_allclose(np.asarray(h2), np.asarray(h2_ref),
                               atol=1e-5, rtol=1e-5)
    np.testing.assert_allclose(np.asarray(c2), np.asarray(c2_ref),
                               atol=1e-5, rtol=1e-5)

    print("KERNEL_OK")
</pallas_src>

<mosaic_0001>
module attributes {stable_mosaic.version = 11 : i64} {
  func.func @_drqn_kernel_zero_state(%arg0: i32, %arg1: memref<8x2x16xf32, #tpu.memory_space<vmem>>, %arg2: memref<16x128xf32, #tpu.memory_space<vmem>>, %arg3: memref<32x128xf32, #tpu.memory_space<vmem>>, %arg4: memref<1x128xf32, #tpu.memory_space<vmem>>, %arg5: memref<32x4xf32, #tpu.memory_space<vmem>>, %arg6: memref<1x4xf32, #tpu.memory_space<vmem>>, %arg7: memref<2x4xf32, #tpu.memory_space<vmem>>, %arg8: memref<2x32xf32, #tpu.memory_space<vmem>>, %arg9: memref<2x32xf32, #tpu.memory_space<vmem>>) attributes {dimension_semantics = [#tpu.dimension_semantics<parallel>], iteration_bounds = array<i64: 1>, scalar_prefetch = 0 : i64, scratch_operands = 0 : i64, tpu.core_type = #tpu.core_type<tc>, window_params = [{transform_indices = @transform_0, window_bounds = array<i64: 8, 2, 16>}, {pipeline_mode = #tpu.pipeline_mode<synchronous>, transform_indices = @transform_1, window_bounds = array<i64: 16, 128>}, {pipeline_mode = #tpu.pipeline_mode<synchronous>, transform_indices = @transform_2, window_bounds = array<i64: 32, 128>}, {pipeline_mode = #tpu.pipeline_mode<synchronous>, transform_indices = @transform_3, window_bounds = array<i64: 1, 128>}, {pipeline_mode = #tpu.pipeline_mode<synchronous>, transform_indices = @transform_4, window_bounds = array<i64: 32, 4>}, {pipeline_mode = #tpu.pipeline_mode<synchronous>, transform_indices = @transform_5, window_bounds = array<i64: 1, 4>}, {transform_indices = @transform_6, window_bounds = array<i64: 2, 4>}, {transform_indices = @transform_7, window_bounds = array<i64: 2, 32>}, {transform_indices = @transform_8, window_bounds = array<i64: 2, 32>}]} {
    %cst = arith.constant 0.000000e+00 : f32
    %0 = vector.broadcast %cst : f32 to vector<2x32xf32>
    %cst_0 = arith.constant 0.000000e+00 : f32
    %1 = vector.broadcast %cst_0 : f32 to vector<2x32xf32>
    %c0 = arith.constant 0 : index
    %c0_1 = arith.constant 0 : index
    %c0_2 = arith.constant 0 : index
    %2 = vector.load %arg1[%c0, %c0_1, %c0_2] : memref<8x2x16xf32, #tpu.memory_space<vmem>>, vector<8x2x16xf32>
    %3 = vector.shape_cast %2 : vector<8x2x16xf32> to vector<16x16xf32>
    %c0_3 = arith.constant 0 : index
    %c0_4 = arith.constant 0 : index
    %4 = vector.load %arg2[%c0_3, %c0_4] : memref<16x128xf32, #tpu.memory_space<vmem>>, vector<16x128xf32>
    %cst_5 = arith.constant dense<0.000000e+00> : vector<16x128xf32>
    %5 = tpu.matmul %3, %4, %cst_5 {dimension_numbers = #tpu.dot_dimension_numbers<[1], [0], [0], [1], [0, 0, 1, 1], [], []>} : vector<16x16xf32>, vector<16x128xf32>, vector<16x128xf32> -> vector<16x128xf32>
    %c0_6 = arith.constant 0 : index
    %c0_7 = arith.constant 0 : index
    %6 = vector.load %arg4[%c0_6, %c0_7] : memref<1x128xf32, #tpu.memory_space<vmem>>, vector<1x128xf32>
    %7 = vector.broadcast %6 : vector<1x128xf32> to vector<16x128xf32>
    %8 = arith.addf %5, %7 : vector<16x128xf32>
    %9 = vector.shape_cast %8 : vector<16x128xf32> to vector<8x2x128xf32>
    %c0_8 = arith.constant 0 : index
    %c0_9 = arith.constant 0 : index
    %10 = vector.load %arg3[%c0_8, %c0_9] : memref<32x128xf32, #tpu.memory_space<vmem>>, vector<32x128xf32>
    %11 = vector.extract_strided_slice %9 {offsets = [0, 0, 0], sizes = [1, 2, 128], strides = [1, 1, 1]} : vector<8x2x128xf32> to vector<1x2x128xf32>
    %12 = vector.shape_cast %11 : vector<1x2x128xf32> to vector<2x128xf32>
    %cst_10 = arith.constant dense<0.000000e+00> : vector<2x128xf32>
    %13 = tpu.matmul %0, %10, %cst_10 {dimension_numbers = #tpu.dot_dimension_numbers<[1], [0], [0], [1], [0, 0, 1, 1], [], []>} : vector<2x32xf32>, vector<32x128xf32>, vector<2x128xf32> -> vector<2x128xf32>
    %14 = arith.addf %12, %13 : vector<2x128xf32>
    %15 = vector.extract_strided_slice %14 {offsets = [0, 0], sizes = [2, 96], strides = [1, 1]} : vector<2x128xf32> to vector<2x96xf32>
    %16 = arith.negf %15 : vector<2x96xf32>
    %17 = math.exp %16 : vector<2x96xf32>
    %cst_11 = arith.constant 1.000000e+00 : f32
    %18 = vector.broadcast %cst_11 : f32 to vector<2x96xf32>
    %19 = arith.addf %18, %17 : vector<2x96xf32>
    %20 = arith.divf %18, %19 : vector<2x96xf32>
    %21 = vector.extract_strided_slice %20 {offsets = [0, 0], sizes = [2, 32], strides = [1, 1]} : vector<2x96xf32> to vector<2x32xf32>
    %22 = vector.extract_strided_slice %20 {offsets = [0, 32], sizes = [2, 32], strides = [1, 1]} : vector<2x96xf32> to vector<2x32xf32>
    %23 = vector.extract_strided_slice %20 {offsets = [0, 64], sizes = [2, 32], strides = [1, 1]} : vector<2x96xf32> to vector<2x32xf32>
    %24 = vector.extract_strided_slice %14 {offsets = [0, 96], sizes = [2, 32], strides = [1, 1]} : vector<2x128xf32> to vector<2x32xf32>
    %25 = math.tanh %24 : vector<2x32xf32>
    %26 = arith.mulf %22, %1 : vector<2x32xf32>
    %27 = arith.mulf %21, %25 : vector<2x32xf32>
    %28 = arith.addf %26, %27 : vector<2x32xf32>
    %29 = math.tanh %28 : vector<2x32xf32>
    %30 = arith.mulf %23, %29 : vector<2x32xf32>
    %31 = vector.extract_strided_slice %9 {offsets = [1, 0, 0], sizes = [1, 2, 128], strides = [1, 1, 1]} : vector<8x2x128xf32> to vector<1x2x128xf32>
    %32 = vector.shape_cast %31 : vector<1x2x128xf32> to vector<2x128xf32>
    %cst_12 = arith.constant dense<0.000000e+00> : vector<2x128xf32>
    %33 = tpu.matmul %30, %10, %cst_12 {dimension_numbers = #tpu.dot_dimension_numbers<[1], [0], [0], [1], [0, 0, 1, 1], [], []>} : vector<2x32xf32>, vector<32x128xf32>, vector<2x128xf32> -> vector<2x128xf32>
    %34 = arith.addf %32, %33 : vector<2x128xf32>
    %35 = vector.extract_strided_slice %34 {offsets = [0, 0], sizes = [2, 96], strides = [1, 1]} : vector<2x128xf32> to vector<2x96xf32>
    %36 = arith.negf %35 : vector<2x96xf32>
    %37 = math.exp %36 : vector<2x96xf32>
    %cst_13 = arith.constant 1.000000e+00 : f32
    %38 = vector.broadcast %cst_13 : f32 to vector<2x96xf32>
    %39 = arith.addf %38, %37 : vector<2x96xf32>
    %40 = arith.divf %38, %39 : vector<2x96xf32>
    %41 = vector.extract_strided_slice %40 {offsets = [0, 0], sizes = [2, 32], strides = [1, 1]} : vector<2x96xf32> to vector<2x32xf32>
    %42 = vector.extract_strided_slice %40 {offsets = [0, 32], sizes = [2, 32], strides = [1, 1]} : vector<2x96xf32> to vector<2x32xf32>
    %43 = vector.extract_strided_slice %40 {offsets = [0, 64], sizes = [2, 32], strides = [1, 1]} : vector<2x96xf32> to vector<2x32xf32>
    %44 = vector.extract_strided_slice %34 {offsets = [0, 96], sizes = [2, 32], strides = [1, 1]} : vector<2x128xf32> to vector<2x32xf32>
    %45 = math.tanh %44 : vector<2x32xf32>
    %46 = arith.mulf %42, %28 : vector<2x32xf32>
    %47 = arith.mulf %41, %45 : vector<2x32xf32>
    %48 = arith.addf %46, %47 : vector<2x32xf32>
    %49 = math.tanh %48 : vector<2x32xf32>
    %50 = arith.mulf %43, %49 : vector<2x32xf32>
    %51 = vector.extract_strided_slice %9 {offsets = [2, 0, 0], sizes = [1, 2, 128], strides = [1, 1, 1]} : vector<8x2x128xf32> to vector<1x2x128xf32>
    %52 = vector.shape_cast %51 : vector<1x2x128xf32> to vector<2x128xf32>
    %cst_14 = arith.constant dense<0.000000e+00> : vector<2x128xf32>
    %53 = tpu.matmul %50, %10, %cst_14 {dimension_numbers = #tpu.dot_dimension_numbers<[1], [0], [0], [1], [0, 0, 1, 1], [], []>} : vector<2x32xf32>, vector<32x128xf32>, vector<2x128xf32> -> vector<2x128xf32>
    %54 = arith.addf %52, %53 : vector<2x128xf32>
    %55 = vector.extract_strided_slice %54 {offsets = [0, 0], sizes = [2, 96], strides = [1, 1]} : vector<2x128xf32> to vector<2x96xf32>
    %56 = arith.negf %55 : vector<2x96xf32>
    %57 = math.exp %56 : vector<2x96xf32>
    %cst_15 = arith.constant 1.000000e+00 : f32
    %58 = vector.broadcast %cst_15 : f32 to vector<2x96xf32>
    %59 = arith.addf %58, %57 : vector<2x96xf32>
    %60 = arith.divf %58, %59 : vector<2x96xf32>
    %61 = vector.extract_strided_slice %60 {offsets = [0, 0], sizes = [2, 32], strides = [1, 1]} : vector<2x96xf32> to vector<2x32xf32>
    %62 = vector.extract_strided_slice %60 {offsets = [0, 32], sizes = [2, 32], strides = [1, 1]} : vector<2x96xf32> to vector<2x32xf32>
    %63 = vector.extract_strided_slice %60 {offsets = [0, 64], sizes = [2, 32], strides = [1, 1]} : vector<2x96xf32> to vector<2x32xf32>
    %64 = vector.extract_strided_slice %54 {offsets = [0, 96], sizes = [2, 32], strides = [1, 1]} : vector<2x128xf32> to vector<2x32xf32>
    %65 = math.tanh %64 : vector<2x32xf32>
    %66 = arith.mulf %62, %48 : vector<2x32xf32>
    %67 = arith.mulf %61, %65 : vector<2x32xf32>
    %68 = arith.addf %66, %67 : vector<2x32xf32>
    %69 = math.tanh %68 : vector<2x32xf32>
    %70 = arith.mulf %63, %69 : vector<2x32xf32>
    %71 = vector.extract_strided_slice %9 {offsets = [3, 0, 0], sizes = [1, 2, 128], strides = [1, 1, 1]} : vector<8x2x128xf32> to vector<1x2x128xf32>
    %72 = vector.shape_cast %71 : vector<1x2x128xf32> to vector<2x128xf32>
    %cst_16 = arith.constant dense<0.000000e+00> : vector<2x128xf32>
    %73 = tpu.matmul %70, %10, %cst_16 {dimension_numbers = #tpu.dot_dimension_numbers<[1], [0], [0], [1], [0, 0, 1, 1], [], []>} : vector<2x32xf32>, vector<32x128xf32>, vector<2x128xf32> -> vector<2x128xf32>
    %74 = arith.addf %72, %73 : vector<2x128xf32>
    %75 = vector.extract_strided_slice %74 {offsets = [0, 0], sizes = [2, 96], strides = [1, 1]} : vector<2x128xf32> to vector<2x96xf32>
    %76 = arith.negf %75 : vector<2x96xf32>
    %77 = math.exp %76 : vector<2x96xf32>
    %cst_17 = arith.constant 1.000000e+00 : f32
    %78 = vector.broadcast %cst_17 : f32 to vector<2x96xf32>
    %79 = arith.addf %78, %77 : vector<2x96xf32>
    %80 = arith.divf %78, %79 : vector<2x96xf32>
    %81 = vector.extract_strided_slice %80 {offsets = [0, 0], sizes = [2, 32], strides = [1, 1]} : vector<2x96xf32> to vector<2x32xf32>
    %82 = vector.extract_strided_slice %80 {offsets = [0, 32], sizes = [2, 32], strides = [1, 1]} : vector<2x96xf32> to vector<2x32xf32>
    %83 = vector.extract_strided_slice %80 {offsets = [0, 64], sizes = [2, 32], strides = [1, 1]} : vector<2x96xf32> to vector<2x32xf32>
    %84 = vector.extract_strided_slice %74 {offsets = [0, 96], sizes = [2, 32], strides = [1, 1]} : vector<2x128xf32> to vector<2x32xf32>
    %85 = math.tanh %84 : vector<2x32xf32>
    %86 = arith.mulf %82, %68 : vector<2x32xf32>
    %87 = arith.mulf %81, %85 : vector<2x32xf32>
    %88 = arith.addf %86, %87 : vector<2x32xf32>
    %89 = math.tanh %88 : vector<2x32xf32>
    %90 = arith.mulf %83, %89 : vector<2x32xf32>
    %91 = vector.extract_strided_slice %9 {offsets = [4, 0, 0], sizes = [1, 2, 128], strides = [1, 1, 1]} : vector<8x2x128xf32> to vector<1x2x128xf32>
    %92 = vector.shape_cast %91 : vector<1x2x128xf32> to vector<2x128xf32>
    %cst_18 = arith.constant dense<0.000000e+00> : vector<2x128xf32>
    %93 = tpu.matmul %90, %10, %cst_18 {dimension_numbers = #tpu.dot_dimension_numbers<[1], [0], [0], [1], [0, 0, 1, 1], [], []>} : vector<2x32xf32>, vector<32x128xf32>, vector<2x128xf32> -> vector<2x128xf32>
    %94 = arith.addf %92, %93 : vector<2x128xf32>
    %95 = vector.extract_strided_slice %94 {offsets = [0, 0], sizes = [2, 96], strides = [1, 1]} : vector<2x128xf32> to vector<2x96xf32>
    %96 = arith.negf %95 : vector<2x96xf32>
    %97 = math.exp %96 : vector<2x96xf32>
    %cst_19 = arith.constant 1.000000e+00 : f32
    %98 = vector.broadcast %cst_19 : f32 to vector<2x96xf32>
    %99 = arith.addf %98, %97 : vector<2x96xf32>
    %100 = arith.divf %98, %99 : vector<2x96xf32>
    %101 = vector.extract_strided_slice %100 {offsets = [0, 0], sizes = [2, 32], strides = [1, 1]} : vector<2x96xf32> to vector<2x32xf32>
    %102 = vector.extract_strided_slice %100 {offsets = [0, 32], sizes = [2, 32], strides = [1, 1]} : vector<2x96xf32> to vector<2x32xf32>
    %103 = vector.extract_strided_slice %100 {offsets = [0, 64], sizes = [2, 32], strides = [1, 1]} : vector<2x96xf32> to vector<2x32xf32>
    %104 = vector.extract_strided_slice %94 {offsets = [0, 96], sizes = [2, 32], strides = [1, 1]} : vector<2x128xf32> to vector<2x32xf32>
    %105 = math.tanh %104 : vector<2x32xf32>
    %106 = arith.mulf %102, %88 : vector<2x32xf32>
    %107 = arith.mulf %101, %105 : vector<2x32xf32>
    %108 = arith.addf %106, %107 : vector<2x32xf32>
    %109 = math.tanh %108 : vector<2x32xf32>
    %110 = arith.mulf %103, %109 : vector<2x32xf32>
    %111 = vector.extract_strided_slice %9 {offsets = [5, 0, 0], sizes = [1, 2, 128], strides = [1, 1, 1]} : vector<8x2x128xf32> to vector<1x2x128xf32>
    %112 = vector.shape_cast %111 : vector<1x2x128xf32> to vector<2x128xf32>
    %cst_20 = arith.constant dense<0.000000e+00> : vector<2x128xf32>
    %113 = tpu.matmul %110, %10, %cst_20 {dimension_numbers = #tpu.dot_dimension_numbers<[1], [0], [0], [1], [0, 0, 1, 1], [], []>} : vector<2x32xf32>, vector<32x128xf32>, vector<2x128xf32> -> vector<2x128xf32>
    %114 = arith.addf %112, %113 : vector<2x128xf32>
    %115 = vector.extract_strided_slice %114 {offsets = [0, 0], sizes = [2, 96], strides = [1, 1]} : vector<2x128xf32> to vector<2x96xf32>
    %116 = arith.negf %115 : vector<2x96xf32>
    %117 = math.exp %116 : vector<2x96xf32>
    %cst_21 = arith.constant 1.000000e+00 : f32
    %118 = vector.broadcast %cst_21 : f32 to vector<2x96xf32>
    %119 = arith.addf %118, %117 : vector<2x96xf32>
    %120 = arith.divf %118, %119 : vector<2x96xf32>
    %121 = vector.extract_strided_slice %120 {offsets = [0, 0], sizes = [2, 32], strides = [1, 1]} : vector<2x96xf32> to vector<2x32xf32>
    %122 = vector.extract_strided_slice %120 {offsets = [0, 32], sizes = [2, 32], strides = [1, 1]} : vector<2x96xf32> to vector<2x32xf32>
    %123 = vector.extract_strided_slice %120 {offsets = [0, 64], sizes = [2, 32], strides = [1, 1]} : vector<2x96xf32> to vector<2x32xf32>
    %124 = vector.extract_strided_slice %114 {offsets = [0, 96], sizes = [2, 32], strides = [1, 1]} : vector<2x128xf32> to vector<2x32xf32>
    %125 = math.tanh %124 : vector<2x32xf32>
    %126 = arith.mulf %122, %108 : vector<2x32xf32>
    %127 = arith.mulf %121, %125 : vector<2x32xf32>
    %128 = arith.addf %126, %127 : vector<2x32xf32>
    %129 = math.tanh %128 : vector<2x32xf32>
    %130 = arith.mulf %123, %129 : vector<2x32xf32>
    %131 = vector.extract_strided_slice %9 {offsets = [6, 0, 0], sizes = [1, 2, 128], strides = [1, 1, 1]} : vector<8x2x128xf32> to vector<1x2x128xf32>
    %132 = vector.shape_cast %131 : vector<1x2x128xf32> to vector<2x128xf32>
    %cst_22 = arith.constant dense<0.000000e+00> : vector<2x128xf32>
    %133 = tpu.matmul %130, %10, %cst_22 {dimension_numbers = #tpu.dot_dimension_numbers<[1], [0], [0], [1], [0, 0, 1, 1], [], []>} : vector<2x32xf32>, vector<32x128xf32>, vector<2x128xf32> -> vector<2x128xf32>
    %134 = arith.addf %132, %133 : vector<2x128xf32>
    %135 = vector.extract_strided_slice %134 {offsets = [0, 0], sizes = [2, 96], strides = [1, 1]} : vector<2x128xf32> to vector<2x96xf32>
    %136 = arith.negf %135 : vector<2x96xf32>
    %137 = math.exp %136 : vector<2x96xf32>
    %cst_23 = arith.constant 1.000000e+00 : f32
    %138 = vector.broadcast %cst_23 : f32 to vector<2x96xf32>
    %139 = arith.addf %138, %137 : vector<2x96xf32>
    %140 = arith.divf %138, %139 : vector<2x96xf32>
    %141 = vector.extract_strided_slice %140 {offsets = [0, 0], sizes = [2, 32], strides = [1, 1]} : vector<2x96xf32> to vector<2x32xf32>
    %142 = vector.extract_strided_slice %140 {offsets = [0, 32], sizes = [2, 32], strides = [1, 1]} : vector<2x96xf32> to vector<2x32xf32>
    %143 = vector.extract_strided_slice %140 {offsets = [0, 64], sizes = [2, 32], strides = [1, 1]} : vector<2x96xf32> to vector<2x32xf32>
    %144 = vector.extract_strided_slice %134 {offsets = [0, 96], sizes = [2, 32], strides = [1, 1]} : vector<2x128xf32> to vector<2x32xf32>
    %145 = math.tanh %144 : vector<2x32xf32>
    %146 = arith.mulf %142, %128 : vector<2x32xf32>
    %147 = arith.mulf %141, %145 : vector<2x32xf32>
    %148 = arith.addf %146, %147 : vector<2x32xf32>
    %149 = math.tanh %148 : vector<2x32xf32>
    %150 = arith.mulf %143, %149 : vector<2x32xf32>
    %151 = vector.extract_strided_slice %9 {offsets = [7, 0, 0], sizes = [1, 2, 128], strides = [1, 1, 1]} : vector<8x2x128xf32> to vector<1x2x128xf32>
    %152 = vector.shape_cast %151 : vector<1x2x128xf32> to vector<2x128xf32>
    %cst_24 = arith.constant dense<0.000000e+00> : vector<2x128xf32>
    %153 = tpu.matmul %150, %10, %cst_24 {dimension_numbers = #tpu.dot_dimension_numbers<[1], [0], [0], [1], [0, 0, 1, 1], [], []>} : vector<2x32xf32>, vector<32x128xf32>, vector<2x128xf32> -> vector<2x128xf32>
    %154 = arith.addf %152, %153 : vector<2x128xf32>
    %155 = vector.extract_strided_slice %154 {offsets = [0, 0], sizes = [2, 96], strides = [1, 1]} : vector<2x128xf32> to vector<2x96xf32>
    %156 = arith.negf %155 : vector<2x96xf32>
    %157 = math.exp %156 : vector<2x96xf32>
    %cst_25 = arith.constant 1.000000e+00 : f32
    %158 = vector.broadcast %cst_25 : f32 to vector<2x96xf32>
    %159 = arith.addf %158, %157 : vector<2x96xf32>
    %160 = arith.divf %158, %159 : vector<2x96xf32>
    %161 = vector.extract_strided_slice %160 {offsets = [0, 0], sizes = [2, 32], strides = [1, 1]} : vector<2x96xf32> to vector<2x32xf32>
    %162 = vector.extract_strided_slice %160 {offsets = [0, 32], sizes = [2, 32], strides = [1, 1]} : vector<2x96xf32> to vector<2x32xf32>
    %163 = vector.extract_strided_slice %160 {offsets = [0, 64], sizes = [2, 32], strides = [1, 1]} : vector<2x96xf32> to vector<2x32xf32>
    %164 = vector.extract_strided_slice %154 {offsets = [0, 96], sizes = [2, 32], strides = [1, 1]} : vector<2x128xf32> to vector<2x32xf32>
    %165 = math.tanh %164 : vector<2x32xf32>
    %166 = arith.mulf %162, %148 : vector<2x32xf32>
    %167 = arith.mulf %161, %165 : vector<2x32xf32>
    %168 = arith.addf %166, %167 : vector<2x32xf32>
    %169 = math.tanh %168 : vector<2x32xf32>
    %170 = arith.mulf %163, %169 : vector<2x32xf32>
    %c0_26 = arith.constant 0 : index
    %c0_27 = arith.constant 0 : index
    %171 = vector.load %arg5[%c0_26, %c0_27] : memref<32x4xf32, #tpu.memory_space<vmem>>, vector<32x4xf32>
    %cst_28 = arith.constant dense<0.000000e+00> : vector<2x4xf32>
    %172 = tpu.matmul %170, %171, %cst_28 {dimension_numbers = #tpu.dot_dimension_numbers<[1], [0], [0], [1], [0, 0, 1, 1], [], []>} : vector<2x32xf32>, vector<32x4xf32>, vector<2x4xf32> -> vector<2x4xf32>
    %c0_29 = arith.constant 0 : index
    %c0_30 = arith.constant 0 : index
    %173 = vector.load %arg6[%c0_29, %c0_30] : memref<1x4xf32, #tpu.memory_space<vmem>>, vector<1x4xf32>
    %174 = vector.broadcast %173 : vector<1x4xf32> to vector<2x4xf32>
    %175 = arith.addf %172, %174 : vector<2x4xf32>
    %c0_31 = arith.constant 0 : index
    %c0_32 = arith.constant 0 : index
    %176 = vector.load %arg7[%c0_31, %c0_32] : memref<2x4xf32, #tpu.memory_space<vmem>>, vector<2x4xf32>
    tpu.vector_store %arg7[%c0_31, %c0_32], %175 {strides = array<i32>} : memref<2x4xf32, #tpu.memory_space<vmem>>, vector<2x4xf32>,
    %c0_33 = arith.constant 0 : index
    %c0_34 = arith.constant 0 : index
    %177 = vector.load %arg8[%c0_33, %c0_34] : memref<2x32xf32, #tpu.memory_space<vmem>>, vector<2x32xf32>
    tpu.vector_store %arg8[%c0_33, %c0_34], %170 {strides = array<i32>} : memref<2x32xf32, #tpu.memory_space<vmem>>, vector<2x32xf32>,
    %c0_35 = arith.constant 0 : index
    %c0_36 = arith.constant 0 : index
    %178 = vector.load %arg9[%c0_35, %c0_36] : memref<2x32xf32, #tpu.memory_space<vmem>>, vector<2x32xf32>
    tpu.vector_store %arg9[%c0_35, %c0_36], %168 {strides = array<i32>} : memref<2x32xf32, #tpu.memory_space<vmem>>, vector<2x32xf32>,
    return
  }
  func.func @transform_0(%arg0: i32) -> (i32, i32, i32) {
    %c0_i32 = arith.constant 0 : i32
    %c0_i32_0 = arith.constant 0 : i32
    %c0_i32_1 = arith.constant 0 : i32
    return %c0_i32, %arg0, %c0_i32_0 : i32, i32, i32
  }
  func.func @transform_1(%arg0: i32) -> (i32, i32) {
    %c0_i32 = arith.constant 0 : i32
    %c0_i32_0 = arith.constant 0 : i32
    %c0_i32_1 = arith.constant 0 : i32
    return %c0_i32, %c0_i32_0 : i32, i32
  }
  func.func @transform_2(%arg0: i32) -> (i32, i32) {
    %c0_i32 = arith.constant 0 : i32
    %c0_i32_0 = arith.constant 0 : i32
    %c0_i32_1 = arith.constant 0 : i32
    return %c0_i32, %c0_i32_0 : i32, i32
  }
  func.func @transform_3(%arg0: i32) -> (i32, i32) {
    %c0_i32 = arith.constant 0 : i32
    %c0_i32_0 = arith.constant 0 : i32
    %c0_i32_1 = arith.constant 0 : i32
    return %c0_i32, %c0_i32_0 : i32, i32
  }
  func.func @transform_4(%arg0: i32) -> (i32, i32) {
    %c0_i32 = arith.constant 0 : i32
    %c0_i32_0 = arith.constant 0 : i32
    %c0_i32_1 = arith.constant 0 : i32
    return %c0_i32, %c0_i32_0 : i32, i32
  }
  func.func @transform_5(%arg0: i32) -> (i32, i32) {
    %c0_i32 = arith.constant 0 : i32
    %c0_i32_0 = arith.constant 0 : i32
    %c0_i32_1 = arith.constant 0 : i32
    return %c0_i32, %c0_i32_0 : i32, i32
  }
  func.func @transform_6(%arg0: i32) -> (i32, i32) {
    %c0_i32 = arith.constant 0 : i32
    %c0_i32_0 = arith.constant 0 : i32
    return %arg0, %c0_i32 : i32, i32
  }
  func.func @transform_7(%arg0: i32) -> (i32, i32) {
    %c0_i32 = arith.constant 0 : i32
    %c0_i32_0 = arith.constant 0 : i32
    return %arg0, %c0_i32 : i32, i32
  }
  func.func @transform_8(%arg0: i32) -> (i32, i32) {
    %c0_i32 = arith.constant 0 : i32
    %c0_i32_0 = arith.constant 0 : i32
    return %arg0, %c0_i32 : i32, i32
  }
}

</mosaic_0001>

<bundles_post_ra>
// kernel: tpu_custom_call.1
= control target key start
LH: loop header
LB: loop body
LE: loop exit
PB: predicated region body
PF: predicated region fallthrough
CT: control target
= control target key end

     0   :  { %14 = vsyncpa [#allocation3], 0  ;;  %s1151_s0 = inlined_call_operand.hbm [shape: f32[8,2,16], index: 0, kind: input, shape index: {}]   ;;  %s1152_s1 = inlined_call_operand.hbm [shape: f32[16,128], index: 1, kind: input, shape index: {}]   ;;  %s1153_s2 = inlined_call_operand.vmem [shape: f32[32,128], index: 2, kind: input, shape index: {}]   ;;  %s1154_s3 = inlined_call_operand.vmem [shape: f32[1,128], index: 3, kind: input, shape index: {}]   ;;  %s1155_s4 = inlined_call_operand.vmem [shape: f32[32,4], index: 4, kind: input, shape index: {}]   ;;  %s1156_s5 = inlined_call_operand.vmem [shape: f32[1,4], index: 5, kind: input, shape index: {}]   ;;  %s1157_s6 = inlined_call_operand.hbm [shape: f32[2,4], index: 6, kind: output, shape index: {0}]   ;;  %s1158_s7 = inlined_call_operand.hbm [shape: f32[2,32], index: 7, kind: output, shape index: {1}]   ;;  %s1159_s8 = inlined_call_operand.hbm [shape: f32[2,32], index: 8, kind: output, shape index: {2}]  }
   0x1   :  { %15 = vsyncpa [#allocation6], 0 }
   0x2   :  { %16 = vsyncpa [#allocation4], 0 }
   0x3   :  { %17 = vsyncpa [#allocation9], 0  ;;  %s22_s29 = sshll.u32 %s1151_s0, 4  ;;  %s986_s30 = smov [#allocation2]   ;;  %s23_s29 = int_to_ptr.hbm [resolvable:$true] %s22_s29 }
   0x4   :  { %s24_s9 = sshll.u32 %s986_s30, 4  ;;  %s35_s12 = sshll.u32 %s1152_s1, 4  ;;  %s25_s9 = int_to_ptr.vmem [resolvable:$true] %s24_s9  ;;  %s36_s12 = int_to_ptr.hbm [resolvable:$true] %s35_s12 }
   0x5   :  { %s987_s13 = smov 32   ;;  %s988_s14 = smov 2  }
   0x6   :  { %30 = dma.hbm_to_vmem [thread:$0]  %s23_s29, 256, %s25_s9, [#allocation3], %s987_s13, %s987_s13, %s988_s14  }
   0x7   :  { %s989_s15 = smov [#allocation5]   ;;  %s990_s17 = smov 128  }
   0x8   :  { %s37_s16 = sshll.u32 %s989_s15, 4  ;;  %s991_s18 = smov 8   ;;  %s38_s16 = int_to_ptr.vmem [resolvable:$true] %s37_s16 }
   0x9   :  { %43 = dma.hbm_to_vmem [thread:$0]  %s36_s12, 256, %s38_s16, [#allocation6], %s990_s17, %s990_s17, %s991_s18  }
   0xa   :  { %978 = dma.done.wait [#allocation3], 256  }
   0xb   :  { %979 = vsyncadd [#allocation3], 4294967040 }
   0xc   :  { %980 = dma.done.wait [#allocation6], 256  }
   0xd   :  { %981 = vsyncadd [#allocation6], 4294967040  ;;  %v144_v0 = vld [vmem:[%s1153_s2 + $0x18] sm:$0xff]  ;;  %v69_v1 = vld [vmem:[#allocation5 + $0x8] sm:$0xff]  ;;  %v992_v10 = vmov 0.0   ;;  %vm99_vm0 = vcmask 130048  }
   0xe   :  { %v143_v2 = vld [vmem:[%s1153_s2 + $0x10] sm:$0xff]  ;;  %161 = vmatpush.msra.mxu1 %v144_v0  ;;  %118 = vmatpush.msra.mxu0 %v69_v1  ;;  %v68_v3 = vld [vmem:[#allocation5] sm:$0xff]  ;;  %v60_v4 = vld [vmem:[#allocation2] sm:$0x3]  ;;  %vm145_vm5 = vcmask 261120   ;;  %s994_s26 = smov 96  }
   0xf   :  { %v142_v5 = vld [vmem:[%s1153_s2 + $0x8] sm:$0xff]  ;;  %226 = vmatpush.msra.mxu2 %v144_v0  ;;  %291 = vmatpush.msra.mxu3 %v144_v0  ;;  %82 = vst [vmem:[#allocation1] ss:$4 sm:$0xff] %v60_v4  ;;  %v141_v9 = vld [vmem:[%s1153_s2] sm:$0xff]  ;;  %s731_s17 = sshll.u32 %s1158_s7, 4  ;;  %s996_s18 = smov [#allocation10]   ;;  %s732_s17 = int_to_ptr.hbm [resolvable:$true] %s731_s17 }
  0x10   :  { %v61_v6 = vld [vmem:[#allocation2 + $0x2] sm:$0x3]  ;;  %v62_v7 = vld [vmem:[#allocation2 + $0x4] sm:$0x3]  ;;  %162 = vmatpush.msra.mxu1 %v143_v2  ;;  %119 = vmatpush.msra.mxu0 %v68_v3  ;;  %v63_v8 = vld [vmem:[#allocation2 + $0x6] sm:$0x3] }
  0x11   :  { %84 = vst [vmem:[#allocation1 + $0x1] ss:$4 sm:$0xff] %v61_v6  ;;  %227 = vmatpush.msra.mxu2 %v143_v2  ;;  %292 = vmatpush.msra.mxu3 %v143_v2  ;;  %v1067_v12 = vld [vmem:[%s1154_s3] ss:$0 sm:$0xff]  ;;  %s993_s3 = smov 64   ;;  %s742_s1 = sshll.u32 %s1159_s8, 4  ;;  %s743_s1 = int_to_ptr.hbm [resolvable:$true] %s742_s1 }
  0x12   :  { %163 = vmatpush.msra.mxu1 %v142_v5  ;;  %86 = vst [vmem:[#allocation1 + $0x2] ss:$4 sm:$0xff] %v62_v7  ;;  %551 = vmatpush.msrb.mxu0 %v144_v0  ;;  %s997_s7 = smov [#allocation7]   ;;  %s720_s2 = sshll.u32 %s1157_s6, 4  ;;  %s721_s2 = int_to_ptr.hbm [resolvable:$true] %s720_s2 }
  0x13   :  { %88 = vst [vmem:[#allocation1 + $0x3] ss:$4 sm:$0xff] %v63_v8  ;;  %228 = vmatpush.msra.mxu2 %v142_v5  ;;  %293 = vmatpush.msra.mxu3 %v142_v5  ;;  %s718_s22 = sshll.u32 %s997_s7, 4  ;;  %s719_s22 = int_to_ptr.vmem [resolvable:$true] %s718_s22 }
  0x14   :  { %164 = vmatpush.msra.mxu1 %v141_v9  ;;  %552 = vmatpush.msrb.mxu0 %v143_v2 }
  0x15   :  { %165 = vmatmul.f32.vlgmr.msra.gmra.mxu1 %v992_v10  ;;  %229 = vmatpush.msra.mxu2 %v141_v9 }
  0x16   :  { %294 = vmatpush.msra.mxu3 %v141_v9  ;;  %356 = vmatpush.msrb.mxu1 %v144_v0 }
  0x17   :  { %421 = vmatpush.msrb.mxu2 %v144_v0  ;;  %553 = vmatpush.msrb.mxu0 %v142_v5 }
  0x18   :  { %486 = vmatpush.msrb.mxu3 %v144_v0  ;;  %357 = vmatpush.msrb.mxu1 %v143_v2 }
  0x19   :  { %422 = vmatpush.msrb.mxu2 %v143_v2  ;;  %554 = vmatpush.msrb.mxu0 %v141_v9 }
  0x1a   :  { %487 = vmatpush.msrb.mxu3 %v143_v2  ;;  %v97_v11 = vld.sshfl [vmem:[#allocation1] sm:$0xff pattern:$0x73625140]  ;;  %358 = vmatpush.msrb.mxu1 %v142_v5 }
  0x1b   :  { %762 = vmatmul.msk.f32.vlgmr.msra.gmra.mxu0 %vm99_vm0, %v97_v11  ;;  %423 = vmatpush.msrb.mxu2 %v142_v5 }
  0x1c   :  { %359 = vmatpush.msrb.mxu1 %v141_v9  ;;  %488 = vmatpush.msrb.mxu3 %v142_v5 }
  0x1d   :  { %424 = vmatpush.msrb.mxu2 %v141_v9 }
  0x1e   :  { %616 = vmatpush.msra.mxu1 %v144_v0  ;;  %489 = vmatpush.msrb.mxu3 %v141_v9 }
  0x20   :  { %617 = vmatpush.msra.mxu1 %v143_v2 }
  0x22   :  { %618 = vmatpush.msra.mxu1 %v142_v5 }
  0x24   :  { %619 = vmatpush.msra.mxu1 %v141_v9 }
  0x92   :  { %v166_v14 = vpop.f32.mrf.mxu1 }
  0x98   :  { %v121_v13 = vpop.f32.mrf.mxu0 }
  0x99   :  { %v1070_v15 = vadd.f32 %v1067_v12, %v121_v13 }
  0x9b   :  { %v169_v16 = vadd.f32 %v166_v14, %v1070_v15  ;;  %v129_v41 = vrot.slane %v1070_v15, 2  ;;  %v130_v4 = vrot.slane %v1070_v15, 4 }
  0x9d   :  { %794 = vtanh.f32 %v169_v16  ;;  %v764_v18 = vmul.f32 -1.442695, %v169_v16 }
  0x9f   :  { %796 = vpow2.f32 %v764_v18 }
  0xa3   :  { %v795_v17 = vpop.eup %794 }
  0xa4   :  { %192 = vrot.lane.b32.xlu0 %v795_v17, %s987_s13 }
  0xa5   :  { %v797_v19 = vpop.eup %796 }
  0xa6   :  { %v173_v20 = vadd.f32 1.0, %v797_v19 }
  0xa8   :  { %798 = vrcp.f32 %v173_v20  ;;  %v185_v26 = vand.u32 2147483648, %v173_v20  ;;  %vm179_vm2 = vweird.f32 %v173_v20  ;;  %v183_v27 = vand.u32 2147483647, %v173_v20 }
  0xaa   :  { %v186_v29 = vor.u32 1.1754944e-38, %v185_v26  ;;  %vm184_vm4 = vcmp.eq.f32.partialorder %v183_v27, 8.507059e+37 }
  0xae   :  { %v799_v21 = vpop.eup %798 }
  0xaf   :  { %v175_v22 = vmul.f32 %v799_v21, %v173_v20  ;;  %vm180_vm1 = vweird.f32 %v799_v21 }
  0xb0   :  { %vm181_vm3 = vmor %vm179_vm2, %vm180_vm1 }
  0xb1   :  { %v176_v23 = vsub.f32 1.0, %v175_v22 }
  0xb3   :  { %v177_v24 = vmul.f32 %v799_v21, %v176_v23 }
  0xb5   :  { %v178_v25 = vadd.f32 %v799_v21, %v177_v24 }
  0xb7   :  { %v182_v28 = vsel %vm181_vm3, %v799_v21, %v178_v25 }
  0xb8   :  { %v187_v31 = vsel %vm184_vm4, %v186_v29, %v182_v28 }
  0xb9   :  { %v190_v33 = vmul.f32 0.0, %v187_v31 }
 0x116   :  { %v193_v30 = vpop.permute.xlu0 %192 }
 0x117   :  { %v195_v32 = vmul.f32 %v193_v30, %v187_v31 }
 0x119   :  { %197 = vrot.lane.b32.xlu0 %v195_v32, %s987_s13 }
 0x18b   :  { %v198_v34 = vpop.permute.xlu0 %197 }
 0x18c   :  { %v200_v35 = vadd.f32 %v198_v34, %v190_v33  ;;  %v131_v33 = vrot.slane %v1070_v15, 6 }
 0x18e   :  { %800 = vtanh.f32 %v200_v35 }
 0x194   :  { %v801_v36 = vpop.eup %800 }
 0x195   :  { %203 = vrot.lane.b32.xlu1 %v801_v36, %s987_s13 }
 0x207   :  { %v204_v37 = vpop.permute.xlu1 %203 }
 0x208   :  { %v206_v38 = vmul.f32 %v204_v37, %v187_v31 }
 0x20a   :  { %208 = vst [vmem:[#allocation1] ss:$4 sm:$0xff] %v206_v38 }
 0x211   :  { %v209_v39 = vld.sshfl [vmem:[#allocation1] sm:$0xff pattern:$0x73625140] }
 0x212   :  { %210 = vrot.lane.b32.xlu1 %v209_v39, %s993_s3 }
 0x284   :  { %v211_v40 = vpop.permute.xlu1 %210 }
 0x285   :  { %765 = vmatmul.msk.f32.vlgmr.msra.gmra.mxu2 %vm145_vm5, %v211_v40 }
 0x308   :  { %v231_v42 = vpop.f32.mrf.mxu2 }
 0x309   :  { %v234_v43 = vadd.f32 %v231_v42, %v129_v41 }
 0x30b   :  { %802 = vtanh.f32 %v234_v43  ;;  %v766_v45 = vmul.f32 -1.442695, %v234_v43 }
 0x30d   :  { %804 = vpow2.f32 %v766_v45 }
 0x311   :  { %v803_v44 = vpop.eup %802 }
 0x312   :  { %257 = vrot.lane.b32.xlu2 %v803_v44, %s987_s13 }
 0x313   :  { %v805_v46 = vpop.eup %804 }
 0x314   :  { %v238_v47 = vadd.f32 1.0, %v805_v46 }
 0x316   :  { %806 = vrcp.f32 %v238_v47  ;;  %v250_v53 = vand.u32 2147483648, %v238_v47  ;;  %vm244_vm7 = vweird.f32 %v238_v47  ;;  %v248_v54 = vand.u32 2147483647, %v238_v47 }
 0x318   :  { %v251_v56 = vor.u32 1.1754944e-38, %v250_v53  ;;  %vm249_vm9 = vcmp.eq.f32.partialorder %v248_v54, 8.507059e+37 }
 0x31c   :  { %v807_v48 = vpop.eup %806 }
 0x31d   :  { %v240_v49 = vmul.f32 %v807_v48, %v238_v47  ;;  %vm245_vm6 = vweird.f32 %v807_v48 }
 0x31e   :  { %vm246_vm8 = vmor %vm244_vm7, %vm245_vm6 }
 0x31f   :  { %v241_v50 = vsub.f32 1.0, %v240_v49 }
 0x321   :  { %v242_v51 = vmul.f32 %v807_v48, %v241_v50 }
 0x323   :  { %v243_v52 = vadd.f32 %v807_v48, %v242_v51 }
 0x325   :  { %v247_v55 = vsel %vm246_vm8, %v807_v48, %v243_v52 }
 0x326   :  { %v252_v58 = vsel %vm249_vm9, %v251_v56, %v247_v55 }
 0x327   :  { %v255_v60 = vmul.f32 %v252_v58, %v200_v35 }
 0x36c   :  { %v258_v57 = vpop.permute.xlu2 %257 }
 0x36d   :  { %v260_v59 = vmul.f32 %v258_v57, %v252_v58 }
 0x36f   :  { %262 = vrot.lane.b32.xlu2 %v260_v59, %s987_s13  ;;  %v65_v59 = vld [vmem:[#allocation2 + $0xa] sm:$0x3] }
 0x370   :  { %92 = vst [vmem:[#allocation1 + $0x21] ss:$4 sm:$0xff] %v65_v59 }
 0x3c9   :  { %v263_v61 = vpop.permute.xlu2 %262 }
 0x3ca   :  { %v265_v62 = vadd.f32 %v263_v61, %v255_v60  ;;  %v66_v60 = vld [vmem:[#allocation2 + $0xc] sm:$0x3]  ;;  %v67_v61 = vld [vmem:[#allocation2 + $0xe] sm:$0x3] }
 0x3cb   :  { %94 = vst [vmem:[#allocation1 + $0x22] ss:$4 sm:$0xff] %v66_v60 }
 0x3cc   :  { %808 = vtanh.f32 %v265_v62  ;;  %96 = vst [vmem:[#allocation1 + $0x23] ss:$4 sm:$0xff] %v67_v61 }
 0x3d2   :  { %v809_v63 = vpop.eup %808 }
 0x3d3   :  { %268 = vrot.lane.b32.xlu0 %v809_v63, %s987_s13 }
 0x445   :  { %v269_v0 = vpop.permute.xlu0 %268 }
 0x446   :  { %v271_v1 = vmul.f32 %v269_v0, %v252_v58  ;;  %v64_v58 = vld [vmem:[#allocation2 + $0x8] sm:$0x3] }
 0x447   :  { %90 = vst [vmem:[#allocation1 + $0x20] ss:$4 sm:$0xff] %v64_v58 }
 0x448   :  { %273 = vst [vmem:[#allocation1] ss:$4 sm:$0xff] %v271_v1 }
 0x44f   :  { %v274_v2 = vld.sshfl [vmem:[#allocation1] sm:$0xff pattern:$0x73625140] }
 0x450   :  { %275 = vrot.lane.b32.xlu1 %v274_v2, %s993_s3 }
 0x4c2   :  { %v276_v3 = vpop.permute.xlu1 %275 }
 0x4c3   :  { %767 = vmatmul.msk.f32.vlgmr.msra.gmra.mxu3 %vm145_vm5, %v276_v3 }
 0x546   :  { %v296_v5 = vpop.f32.mrf.mxu3 }
 0x547   :  { %v299_v6 = vadd.f32 %v296_v5, %v130_v4 }
 0x549   :  { %810 = vtanh.f32 %v299_v6  ;;  %v768_v8 = vmul.f32 -1.442695, %v299_v6 }
 0x54b   :  { %812 = vpow2.f32 %v768_v8 }
 0x54f   :  { %v811_v7 = vpop.eup %810 }
 0x550   :  { %322 = vrot.lane.b32.xlu2 %v811_v7, %s987_s13 }
 0x551   :  { %v813_v9 = vpop.eup %812 }
 0x552   :  { %v303_v10 = vadd.f32 1.0, %v813_v9 }
 0x554   :  { %814 = vrcp.f32 %v303_v10  ;;  %v315_v18 = vand.u32 2147483648, %v303_v10  ;;  %vm309_vm11 = vweird.f32 %v303_v10  ;;  %v313_v19 = vand.u32 2147483647, %v303_v10 }
 0x556   :  { %v316_v21 = vor.u32 1.1754944e-38, %v315_v18  ;;  %vm314_vm13 = vcmp.eq.f32.partialorder %v313_v19, 8.507059e+37 }
 0x55a   :  { %v815_v11 = vpop.eup %814 }
 0x55b   :  { %v305_v13 = vmul.f32 %v815_v11, %v303_v10  ;;  %vm310_vm10 = vweird.f32 %v815_v11 }
 0x55c   :  { %vm311_vm12 = vmor %vm309_vm11, %vm310_vm10 }
 0x55d   :  { %v306_v14 = vsub.f32 1.0, %v305_v13 }
 0x55f   :  { %v307_v16 = vmul.f32 %v815_v11, %v306_v14 }
 0x561   :  { %v308_v17 = vadd.f32 %v815_v11, %v307_v16 }
 0x563   :  { %v312_v20 = vsel %vm311_vm12, %v815_v11, %v308_v17 }
 0x564   :  { %v317_v23 = vsel %vm314_vm13, %v316_v21, %v312_v20 }
 0x565   :  { %v320_v25 = vmul.f32 %v317_v23, %v265_v62  ;;  %v98_v62 = vld.sshfl [vmem:[#allocation1 + $0x20] sm:$0xff pattern:$0x73625140] }
 0x566   :  { %763 = vmatmul.msk.f32.gmra.mxu0 %vm99_vm0, %v98_v62 }
 0x5aa   :  { %v323_v22 = vpop.permute.xlu2 %322 }
 0x5ab   :  { %v325_v24 = vmul.f32 %v323_v22, %v317_v23 }
 0x5ad   :  { %327 = vrot.lane.b32.xlu0 %v325_v24, %s987_s13 }
 0x5e3   :  { %v124_v0 = vpop.f32.mrf.mxu0 }
 0x5e4   :  { %v1098_v1 = vadd.f32 %v1067_v12, %v124_v0 }
 0x61f   :  { %v328_v26 = vpop.permute.xlu0 %327 }
 0x620   :  { %v330_v27 = vadd.f32 %v328_v26, %v320_v25 }
 0x622   :  { %816 = vtanh.f32 %v330_v27 }
 0x628   :  { %v817_v28 = vpop.eup %816 }
 0x629   :  { %333 = vrot.lane.b32.xlu1 %v817_v28, %s987_s13 }
 0x69b   :  { %v334_v29 = vpop.permute.xlu1 %333 }
 0x69c   :  { %v336_v30 = vmul.f32 %v334_v29, %v317_v23  ;;  %v132_v29 = vrot.slane %v1098_v1, 2 }
 0x69e   :  { %338 = vst [vmem:[#allocation1] ss:$4 sm:$0xff] %v336_v30 }
 0x6a5   :  { %v339_v31 = vld.sshfl [vmem:[#allocation1] sm:$0xff pattern:$0x73625140] }
 0x6a6   :  { %340 = vrot.lane.b32.xlu2 %v339_v31, %s993_s3 }
 0x700   :  { %v341_v32 = vpop.permute.xlu2 %340 }
 0x701   :  { %769 = vmatmul.msk.f32.vlgmr.msrb.gmra.mxu1 %vm145_vm5, %v341_v32 }
 0x77e   :  { %v361_v34 = vpop.f32.mrf.mxu1 }
 0x77f   :  { %v364_v35 = vadd.f32 %v361_v34, %v131_v33 }
 0x781   :  { %818 = vtanh.f32 %v364_v35  ;;  %v770_v37 = vmul.f32 -1.442695, %v364_v35 }
 0x783   :  { %820 = vpow2.f32 %v770_v37 }
 0x787   :  { %v819_v36 = vpop.eup %818 }
 0x788   :  { %387 = vrot.lane.b32.xlu0 %v819_v36, %s987_s13 }
 0x789   :  { %v821_v38 = vpop.eup %820 }
 0x78a   :  { %v368_v39 = vadd.f32 1.0, %v821_v38 }
 0x78c   :  { %822 = vrcp.f32 %v368_v39  ;;  %v380_v45 = vand.u32 2147483648, %v368_v39  ;;  %vm374_vm15 = vweird.f32 %v368_v39  ;;  %v378_v15 = vand.u32 2147483647, %v368_v39 }
 0x78e   :  { %v381_v47 = vor.u32 1.1754944e-38, %v380_v45  ;;  %vm379_vm2 = vcmp.eq.f32.partialorder %v378_v15, 8.507059e+37 }
 0x792   :  { %v823_v40 = vpop.eup %822 }
 0x793   :  { %v370_v41 = vmul.f32 %v823_v40, %v368_v39  ;;  %vm375_vm14 = vweird.f32 %v823_v40 }
 0x794   :  { %vm376_vm1 = vmor %vm374_vm15, %vm375_vm14 }
 0x795   :  { %v371_v42 = vsub.f32 1.0, %v370_v41 }
 0x797   :  { %v372_v43 = vmul.f32 %v823_v40, %v371_v42 }
 0x799   :  { %v373_v44 = vadd.f32 %v823_v40, %v372_v43 }
 0x79b   :  { %v377_v46 = vsel %vm376_vm1, %v823_v40, %v373_v44 }
 0x79c   :  { %v382_v49 = vsel %vm379_vm2, %v381_v47, %v377_v46 }
 0x79d   :  { %v385_v51 = vmul.f32 %v382_v49, %v330_v27 }
 0x7fa   :  { %v388_v48 = vpop.permute.xlu0 %387 }
 0x7fb   :  { %v390_v50 = vmul.f32 %v388_v48, %v382_v49 }
 0x7fd   :  { %392 = vrot.lane.b32.xlu1 %v390_v50, %s987_s13 }
 0x86f   :  { %v393_v52 = vpop.permute.xlu1 %392 }
 0x870   :  { %v395_v53 = vadd.f32 %v393_v52, %v385_v51 }
 0x872   :  { %824 = vtanh.f32 %v395_v53 }
 0x878   :  { %v825_v54 = vpop.eup %824 }
 0x879   :  { %398 = vrot.lane.b32.xlu2 %v825_v54, %s987_s13 }
 0x8d3   :  { %v399_v55 = vpop.permute.xlu2 %398 }
 0x8d4   :  { %v401_v56 = vmul.f32 %v399_v55, %v382_v49  ;;  %v133_v55 = vrot.slane %v1098_v1, 4 }
 0x8d6   :  { %403 = vst [vmem:[#allocation1] ss:$4 sm:$0xff] %v401_v56 }
 0x8dd   :  { %v404_v57 = vld.sshfl [vmem:[#allocation1] sm:$0xff pattern:$0x73625140] }
 0x8de   :  { %405 = vrot.lane.b32.xlu0 %v404_v57, %s993_s3 }
 0x950   :  { %v406_v63 = vpop.permute.xlu0 %405 }
 0x951   :  { %771 = vmatmul.msk.f32.vlgmr.msrb.gmra.mxu2 %vm145_vm5, %v406_v63 }
 0x9d4   :  { %v426_v2 = vpop.f32.mrf.mxu2 }
 0x9d5   :  { %v429_v3 = vadd.f32 %v426_v2, %v1098_v1 }
 0x9d7   :  { %826 = vtanh.f32 %v429_v3  ;;  %v772_v5 = vmul.f32 -1.442695, %v429_v3 }
 0x9d9   :  { %828 = vpow2.f32 %v772_v5 }
 0x9dd   :  { %v827_v4 = vpop.eup %826 }
 0x9de   :  { %452 = vrot.lane.b32.xlu1 %v827_v4, %s987_s13 }
 0x9df   :  { %v829_v6 = vpop.eup %828 }
 0x9e0   :  { %v433_v7 = vadd.f32 1.0, %v829_v6 }
 0x9e2   :  { %830 = vrcp.f32 %v433_v7  ;;  %v445_v12 = vand.u32 2147483648, %v433_v7  ;;  %vm439_vm3 = vweird.f32 %v433_v7  ;;  %v443_v14 = vand.u32 2147483647, %v433_v7 }
 0x9e4   :  { %v446_v17 = vor.u32 1.1754944e-38, %v445_v12  ;;  %vm444_vm6 = vcmp.eq.f32.partialorder %v443_v14, 8.507059e+37 }
 0x9e8   :  { %v831_v8 = vpop.eup %830 }
 0x9e9   :  { %v435_v9 = vmul.f32 %v831_v8, %v433_v7  ;;  %vm440_vm0 = vweird.f32 %v831_v8 }
 0x9ea   :  { %vm441_vm4 = vmor %vm439_vm3, %vm440_vm0  ;;  %vm704_vm3 = vcmask 254976  }
 0x9eb   :  { %v436_v10 = vsub.f32 1.0, %v435_v9 }
 0x9ed   :  { %v437_v11 = vmul.f32 %v831_v8, %v436_v10 }
 0x9ef   :  { %v438_v13 = vadd.f32 %v831_v8, %v437_v11 }
 0x9f1   :  { %v442_v16 = vsel %vm441_vm4, %v831_v8, %v438_v13 }
 0x9f2   :  { %v447_v19 = vsel %vm444_vm6, %v446_v17, %v442_v16 }
 0x9f3   :  { %v450_v21 = vmul.f32 %v447_v19, %v395_v53 }
 0xa50   :  { %v453_v18 = vpop.permute.xlu1 %452 }
 0xa51   :  { %v455_v20 = vmul.f32 %v453_v18, %v447_v19 }
 0xa53   :  { %457 = vrot.lane.b32.xlu2 %v455_v20, %s987_s13  ;;  %v134_v20 = vrot.slane %v1098_v1, 6 }
 0xaad   :  { %v458_v22 = vpop.permute.xlu2 %457 }
 0xaae   :  { %v460_v23 = vadd.f32 %v458_v22, %v450_v21 }
 0xab0   :  { %832 = vtanh.f32 %v460_v23 }
 0xab6   :  { %v833_v24 = vpop.eup %832 }
 0xab7   :  { %463 = vrot.lane.b32.xlu0 %v833_v24, %s987_s13 }
 0xb29   :  { %v464_v25 = vpop.permute.xlu0 %463 }
 0xb2a   :  { %v466_v26 = vmul.f32 %v464_v25, %v447_v19 }
 0xb2c   :  { %468 = vst [vmem:[#allocation1] ss:$4 sm:$0xff] %v466_v26 }
 0xb33   :  { %v469_v27 = vld.sshfl [vmem:[#allocation1] sm:$0xff pattern:$0x73625140] }
 0xb34   :  { %470 = vrot.lane.b32.xlu1 %v469_v27, %s993_s3 }
 0xba6   :  { %v471_v28 = vpop.permute.xlu1 %470 }
 0xba7   :  { %773 = vmatmul.msk.f32.vlgmr.msrb.gmra.mxu3 %vm145_vm5, %v471_v28 }
 0xc2a   :  { %v491_v30 = vpop.f32.mrf.mxu3 }
 0xc2b   :  { %v494_v31 = vadd.f32 %v491_v30, %v132_v29 }
 0xc2d   :  { %834 = vtanh.f32 %v494_v31  ;;  %v774_v33 = vmul.f32 -1.442695, %v494_v31 }
 0xc2f   :  { %836 = vpow2.f32 %v774_v33 }
 0xc33   :  { %v835_v32 = vpop.eup %834 }
 0xc34   :  { %517 = vrot.lane.b32.xlu2 %v835_v32, %s987_s13 }
 0xc35   :  { %v837_v34 = vpop.eup %836 }
 0xc36   :  { %v498_v35 = vadd.f32 1.0, %v837_v34 }
 0xc38   :  { %838 = vrcp.f32 %v498_v35  ;;  %v510_v41 = vand.u32 2147483648, %v498_v35  ;;  %vm504_vm8 = vweird.f32 %v498_v35  ;;  %v508_v42 = vand.u32 2147483647, %v498_v35 }
 0xc3a   :  { %v511_v44 = vor.u32 1.1754944e-38, %v510_v41  ;;  %vm509_vm10 = vcmp.eq.f32.partialorder %v508_v42, 8.507059e+37 }
 0xc3e   :  { %v839_v36 = vpop.eup %838 }
 0xc3f   :  { %v500_v37 = vmul.f32 %v839_v36, %v498_v35  ;;  %vm505_vm7 = vweird.f32 %v839_v36 }
 0xc40   :  { %vm506_vm9 = vmor %vm504_vm8, %vm505_vm7 }
 0xc41   :  { %v501_v38 = vsub.f32 1.0, %v500_v37 }
 0xc43   :  { %v502_v39 = vmul.f32 %v839_v36, %v501_v38 }
 0xc45   :  { %v503_v40 = vadd.f32 %v839_v36, %v502_v39 }
 0xc47   :  { %v507_v43 = vsel %vm506_vm9, %v839_v36, %v503_v40 }
 0xc48   :  { %v512_v15 = vsel %vm509_vm10, %v511_v44, %v507_v43 }
 0xc49   :  { %v515_v47 = vmul.f32 %v512_v15, %v460_v23 }
 0xc8e   :  { %v518_v45 = vpop.permute.xlu2 %517 }
 0xc8f   :  { %v520_v46 = vmul.f32 %v518_v45, %v512_v15 }
 0xc91   :  { %522 = vrot.lane.b32.xlu0 %v520_v46, %s987_s13  ;;  %v665_v46 = vld [vmem:[%s1155_s4 + $0x18] sm:$0xff] }
 0xc92   :  { %689 = vmatpush.msra.mxu2 %v665_v46 }
 0xd03   :  { %v523_v48 = vpop.permute.xlu0 %522 }
 0xd04   :  { %v525_v49 = vadd.f32 %v523_v48, %v515_v47  ;;  %v664_v47 = vld [vmem:[%s1155_s4 + $0x10] sm:$0xff]  ;;  %v663_v48 = vld [vmem:[%s1155_s4 + $0x8] sm:$0xff] }
 0xd05   :  { %690 = vmatpush.msra.mxu2 %v664_v47 }
 0xd06   :  { %840 = vtanh.f32 %v525_v49 }
 0xd07   :  { %691 = vmatpush.msra.mxu2 %v663_v48 }
 0xd0c   :  { %v841_v50 = vpop.eup %840 }
 0xd0d   :  { %528 = vrot.lane.b32.xlu1 %v841_v50, %s987_s13 }
 0xd7f   :  { %v529_v51 = vpop.permute.xlu1 %528 }
 0xd80   :  { %v531_v52 = vmul.f32 %v529_v51, %v512_v15 }
 0xd82   :  { %533 = vst [vmem:[#allocation1] ss:$4 sm:$0xff] %v531_v52 }
 0xd89   :  { %v534_v53 = vld.sshfl [vmem:[#allocation1] sm:$0xff pattern:$0x73625140] }
 0xd8a   :  { %535 = vrot.lane.b32.xlu2 %v534_v53, %s993_s3  ;;  %v793_v53 = vld [vmem:[%s1156_s5] ss:$0 sm:$0xff] }
 0xde4   :  { %v536_v54 = vpop.permute.xlu2 %535 }
 0xde5   :  { %775 = vmatmul.msk.f32.vlgmr.msrb.gmra.mxu0 %vm145_vm5, %v536_v54 }
 0xe62   :  { %v556_v56 = vpop.f32.mrf.mxu0 }
 0xe63   :  { %v559_v57 = vadd.f32 %v556_v56, %v133_v55 }
 0xe65   :  { %842 = vtanh.f32 %v559_v57  ;;  %v776_v59 = vmul.f32 -1.442695, %v559_v57 }
 0xe67   :  { %844 = vpow2.f32 %v776_v59 }
 0xe6b   :  { %v843_v58 = vpop.eup %842 }
 0xe6c   :  { %582 = vrot.lane.b32.xlu0 %v843_v58, %s987_s13 }
 0xe6d   :  { %v845_v60 = vpop.eup %844 }
 0xe6e   :  { %v563_v61 = vadd.f32 1.0, %v845_v60 }
 0xe70   :  { %846 = vrcp.f32 %v563_v61  ;;  %v575_v4 = vand.u32 2147483648, %v563_v61  ;;  %vm569_vm12 = vweird.f32 %v563_v61  ;;  %v573_v5 = vand.u32 2147483647, %v563_v61 }
 0xe72   :  { %v576_v7 = vor.u32 1.1754944e-38, %v575_v4  ;;  %vm574_vm14 = vcmp.eq.f32.partialorder %v573_v5, 8.507059e+37 }
 0xe76   :  { %v847_v62 = vpop.eup %846 }
 0xe77   :  { %v565_v63 = vmul.f32 %v847_v62, %v563_v61  ;;  %vm570_vm11 = vweird.f32 %v847_v62 }
 0xe78   :  { %vm571_vm13 = vmor %vm569_vm12, %vm570_vm11 }
 0xe79   :  { %v566_v0 = vsub.f32 1.0, %v565_v63 }
 0xe7b   :  { %v567_v2 = vmul.f32 %v847_v62, %v566_v0 }
 0xe7d   :  { %v568_v3 = vadd.f32 %v847_v62, %v567_v2 }
 0xe7f   :  { %v572_v6 = vsel %vm571_vm13, %v847_v62, %v568_v3 }
 0xe80   :  { %v577_v9 = vsel %vm574_vm14, %v576_v7, %v572_v6 }
 0xe81   :  { %v580_v11 = vmul.f32 %v577_v9, %v525_v49  ;;  %v662_v49 = vld [vmem:[%s1155_s4] sm:$0xff]  ;;  %s740_s4 = sshll.u32 %s996_s18, 4  ;;  %s741_s4 = int_to_ptr.vmem [resolvable:$true] %s740_s4 }
 0xe82   :  { %692 = vmatpush.msra.mxu2 %v662_v49 }
 0xede   :  { %v583_v8 = vpop.permute.xlu0 %582 }
 0xedf   :  { %v585_v10 = vmul.f32 %v583_v8, %v577_v9 }
 0xee1   :  { %587 = vrot.lane.b32.xlu1 %v585_v10, %s987_s13 }
 0xf53   :  { %v588_v13 = vpop.permute.xlu1 %587 }
 0xf54   :  { %v590_v12 = vadd.f32 %v588_v13, %v580_v11 }
 0xf56   :  { %848 = vtanh.f32 %v590_v12 }
 0xf5c   :  { %v849_v14 = vpop.eup %848 }
 0xf5d   :  { %593 = vrot.lane.b32.xlu2 %v849_v14, %s987_s13 }
 0xfb7   :  { %v594_v16 = vpop.permute.xlu2 %593 }
 0xfb8   :  { %v596_v17 = vmul.f32 %v594_v16, %v577_v9 }
 0xfba   :  { %598 = vst [vmem:[#allocation1] ss:$4 sm:$0xff] %v596_v17 }
 0xfc1   :  { %v599_v18 = vld.sshfl [vmem:[#allocation1] sm:$0xff pattern:$0x73625140] }
 0xfc2   :  { %600 = vrot.lane.b32.xlu0 %v599_v18, %s993_s3 }
0x1034   :  { %v601_v19 = vpop.permute.xlu0 %600 }
0x1035   :  { %777 = vmatmul.msk.f32.vlgmr.msra.gmra.mxu1 %vm145_vm5, %v601_v19 }
0x10b2   :  { %v621_v21 = vpop.f32.mrf.mxu1 }
0x10b3   :  { %v624_v22 = vadd.f32 %v621_v21, %v134_v20 }
0x10b5   :  { %850 = vtanh.f32 %v624_v22  ;;  %v778_v24 = vmul.f32 -1.442695, %v624_v22 }
0x10b7   :  { %852 = vpow2.f32 %v778_v24 }
0x10bb   :  { %v851_v23 = vpop.eup %850 }
0x10bc   :  { %647 = vrot.lane.b32.xlu1 %v851_v23, %s987_s13 }
0x10bd   :  { %v853_v25 = vpop.eup %852 }
0x10be   :  { %v628_v26 = vadd.f32 1.0, %v853_v25 }
0x10c0   :  { %854 = vrcp.f32 %v628_v26  ;;  %v640_v32 = vand.u32 2147483648, %v628_v26  ;;  %vm634_vm1 = vweird.f32 %v628_v26  ;;  %v638_v1 = vand.u32 2147483647, %v628_v26 }
0x10c2   :  { %v641_v34 = vor.u32 1.1754944e-38, %v640_v32  ;;  %vm639_vm0 = vcmp.eq.f32.partialorder %v638_v1, 8.507059e+37 }
0x10c6   :  { %v855_v27 = vpop.eup %854 }
0x10c7   :  { %v630_v28 = vmul.f32 %v855_v27, %v628_v26  ;;  %vm635_vm15 = vweird.f32 %v855_v27 }
0x10c8   :  { %vm636_vm2 = vmor %vm634_vm1, %vm635_vm15 }
0x10c9   :  { %v631_v29 = vsub.f32 1.0, %v630_v28 }
0x10cb   :  { %v632_v30 = vmul.f32 %v855_v27, %v631_v29 }
0x10cd   :  { %v633_v31 = vadd.f32 %v855_v27, %v632_v30 }
0x10cf   :  { %v637_v33 = vsel %vm636_vm2, %v855_v27, %v633_v31 }
0x10d0   :  { %v642_v36 = vsel %vm639_vm0, %v641_v34, %v637_v33 }
0x10d1   :  { %v645_v38 = vmul.f32 %v642_v36, %v590_v12 }
0x112e   :  { %v648_v35 = vpop.permute.xlu1 %647 }
0x112f   :  { %v650_v37 = vmul.f32 %v648_v35, %v642_v36 }
0x1131   :  { %652 = vrot.lane.b32.xlu2 %v650_v37, %s987_s13 }
0x118b   :  { %v653_v39 = vpop.permute.xlu2 %652 }
0x118c   :  { %v655_v40 = vadd.f32 %v653_v39, %v645_v38 }
0x118e   :  { %856 = vtanh.f32 %v655_v40 }
0x1194   :  { %v857_v41 = vpop.eup %856 }
0x1195   :  { %658 = vrot.lane.b32.xlu0 %v857_v41, %s987_s13  ;;  %s995_s13 = smov [#allocation8]  }
0x1196   :  { %s729_s14 = sshll.u32 %s995_s13, 4  ;;  %s730_s14 = int_to_ptr.vmem [resolvable:$true] %s729_s14 }
0x1207   :  { %v659_v42 = vpop.permute.xlu0 %658 }
0x1208   :  { %v661_v43 = vmul.f32 %v659_v42, %v642_v36 }
0x120a   :  { %671 = vst [vmem:[#allocation1] ss:$4 sm:$0xff] %v661_v43 }
0x1211   :  { %v672_v44 = vld.sshfl [vmem:[#allocation1] sm:$0xff pattern:$0x73625140] }
0x1212   :  { %673 = vrot.lane.b32.xlu1 %v672_v44, %s993_s3  ;;  %699 = vst [vmem:[#allocation1] ss:$4 sm:$0xff] %v661_v43 }
0x1219   :  { %v700_v45 = vld.sshfl [vmem:[#allocation1] sm:$0xff pattern:$0x73625140] }
0x121a   :  { %701 = vrot.lane.b32.xlu2 %v700_v45, %s993_s3  ;;  %707 = vst [vmem:[#allocation1] ss:$4 sm:$0xff] %v655_v40 }
0x1221   :  { %v708_v15 = vld.sshfl [vmem:[#allocation1] sm:$0xff pattern:$0x73625140] }
0x1222   :  { %709 = vrot.lane.b32.xlu0 %v708_v15, %s994_s26 }
0x1274   :  { %v702_v50 = vpop.permute.xlu2 %701 }
0x1275   :  { %705 = vst.msk [vmem:[#allocation8] sm:$0x3] %vm704_vm3, %v702_v50 }
0x1276   :  { %734 = dma.vmem_to_hbm [thread:$0]  %s730_s14, 32, %s732_s17, [#allocation9]  }
0x1284   :  { %v674_v51 = vpop.permute.xlu1 %673 }
0x1285   :  { %779 = vmatmul.msk.f32.vlgmr.msra.gmra.mxu2 %vm145_vm5, %v674_v51  ;;  %vm697_vm5 = vcmask 25600  }
0x1294   :  { %v710_v52 = vpop.permute.xlu0 %709 }
0x1295   :  { %712 = vst.msk [vmem:[#allocation10] sm:$0x3] %vm704_vm3, %v710_v52 }
0x1296   :  { %745 = dma.vmem_to_hbm [thread:$0]  %s741_s4, 32, %s743_s1, [#allocation9]  }
0x1308   :  { %v694_v54 = vpop.f32.mrf.mxu2 }
0x1309   :  { %v695_v55 = vadd.f32 %v793_v53, %v694_v54 }
0x130b   :  { %698 = vst.msk [vmem:[#allocation7] sm:$0x3] %vm697_vm5, %v695_v55 }
0x130c   :  { %723 = dma.vmem_to_hbm [thread:$0]  %s719_s22, 32, %s721_s2, [#allocation4]  }
0x130d   :  { %982 = dma.done.wait [#allocation4], 32  }
0x130e   :  { %983 = vsyncadd [#allocation4], 4294967264 }
0x130f   :  { %984 = dma.done.wait [#allocation9], 64  }
0x1310   :  { %985 = vsyncadd [#allocation9], 4294967232 }
0x1311   :  { %758 = vsyncpa [#allocation3], 1 }
0x1312   :  { %759 = vsyncpa [#allocation6], 1 }
0x1313   :  { %760 = vsyncpa [#allocation4], 1 }
0x1314   :  { %761 = vsyncpa [#allocation9], 1 }

</bundles_post_ra>
